<compile_context>
chip_gen: v7x
topology: tpu7x:2x2x1
jax: 0.10.0
libtpu: 0.0.40
codegen_flags: <defaults>
</compile_context>

<pallas_src>
import functools
import math

import numpy as np
import jax
import jax.numpy as jnp
from jax import lax
from jax.experimental import pallas as pl
from jax.experimental.pallas import tpu as pltpu


# ----------------------------------------------------------------------------
# Pallas kernels
# ----------------------------------------------------------------------------
def _conv3x3_bn_relu_kernel(p_ref, w_ref, s_ref, b_ref, o_ref, *, W, TH):
    """3x3 conv (pad=1) + folded-BN + ReLU for one (batch, row-tile) grid cell.

    p_ref: (1, (H+2)*W + 2, Cin) bf16  H-padded, row-flattened, flat-padded input
                                       (full frame; resident across row tiles)
    w_ref: (3, 3, Cin, Cout)      bf16  conv weights (HWIO)
    s_ref, b_ref: (1, Cout)       f32   folded BatchNorm scale / bias
    o_ref: (1, TH*W, Cout)        bf16  output rows [h*TH, (h+1)*TH)
    """
    M = TH * W
    Cout = o_ref.shape[-1]

    # Dynamic window start is 16-aligned by construction (TH*W % 16 == 0 or TH == H).
    r0w = pl.multiple_of(pl.program_id(1) * M, 16)
    L = M + 2 * W + 2
    win = p_ref[0, pl.ds(r0w, L), :]          # one dynamic load; static slices below

    # Output column index per tile row (tile start is W-aligned).
    col = lax.broadcasted_iota(jnp.int32, (M, 1), 0) % W
    mask_l = col != 0          # kx == 0 taps wrap around the left image edge
    mask_r = col != (W - 1)    # kx == 2 taps wrap around the right image edge

    acc = jnp.zeros((M, Cout), jnp.float32)
    for ky in range(3):
        for kx in range(3):
            d = ky * W + kx
            patch = win[d:d + M, :]
            if kx == 0:
                patch = jnp.where(mask_l, patch, jnp.zeros_like(patch))
            elif kx == 2:
                patch = jnp.where(mask_r, patch, jnp.zeros_like(patch))
            acc = acc + jnp.dot(patch, w_ref[ky, kx],
                                preferred_element_type=jnp.float32)

    y = acc * s_ref[...] + b_ref[...]
    o_ref[0] = jnp.maximum(y, 0.0).astype(o_ref.dtype)


def _upsample_bilinear_kernel(x_ref, o_ref, *, TYo, Wo, K, taps):
    """Depthwise transposed-conv (bilinear upsample), one output row tile.

    x_ref: (1, Hu, Wu, C)  bf16 zero-inserted + zero-bordered input (full frame)
    o_ref: (1, TYo, Wo, C) bf16 output rows [t*TYo, (t+1)*TYo)
    taps:  python list of (ky, kx, weight) constants (flipped bilinear kernel)
    """
    y0 = pl.multiple_of(pl.program_id(1) * TYo, TYo)
    win = x_ref[0, pl.ds(y0, TYo + K - 1), :, :].astype(jnp.float32)
    acc = None
    for ky, kx, wv in taps:
        term = wv * win[ky:ky + TYo, kx:kx + Wo, :]
        acc = term if acc is None else acc + term
    o_ref[0] = acc.astype(o_ref.dtype)


# ----------------------------------------------------------------------------
# Pallas wrappers
# ----------------------------------------------------------------------------
def _pick_row_tile(H, W, target_m=512, sublane=16):
    th = max(1, min(H, target_m // max(W, 1)))
    while H % th:
        th -= 1
    if th != H and (th * W) % sublane != 0:
        th = H                      # fall back to a full-frame block (always legal)
    return th


def conv3x3_bn_relu(x, params, residual=None):
    """DeformConv replacement: 3x3 conv (pad=1) + BN(eval) + ReLU.  x: NHWC bf16."""
    if residual is not None:
        x = x + residual            # fused by XLA into the pad producer below
    N, H, W, Cin = x.shape
    Cout = params["w"].shape[-1]

    # Pad H only, flatten rows, pad the flat axis by 1 on each side.  The 3x3 taps
    # then become constant row-shifts of a single 2-D (rows, Cin) buffer.
    xh = jnp.pad(x, ((0, 0), (1, 1), (0, 0), (0, 0)))
    P = jnp.pad(xh.reshape(N, (H + 2) * W, Cin), ((0, 0), (1, 1), (0, 0)))
    Mp = (H + 2) * W + 2

    TH = _pick_row_tile(H, W)
    grid = (N, H // TH)
    kernel = functools.partial(_conv3x3_bn_relu_kernel, W=W, TH=TH)

    flops = 2 * N * H * W * 9 * Cin * Cout
    bytes_accessed = int(N * Mp * Cin * 2 + 9 * Cin * Cout * 2
                         + N * H * W * Cout * 2 + 2 * Cout * 4)

    out = pl.pallas_call(
        kernel,
        out_shape=jax.ShapeDtypeStruct((N, H * W, Cout), jnp.bfloat16),
        grid=grid,
        in_specs=[
            pl.BlockSpec((1, Mp, Cin), lambda n, h: (n, 0, 0)),
            pl.BlockSpec((3, 3, Cin, Cout), lambda n, h: (0, 0, 0, 0)),
            pl.BlockSpec((1, Cout), lambda n, h: (0, 0)),
            pl.BlockSpec((1, Cout), lambda n, h: (0, 0)),
        ],
        out_specs=pl.BlockSpec((1, TH * W, Cout), lambda n, h: (n, h, 0)),
        compiler_params=pltpu.CompilerParams(
            dimension_semantics=("parallel", "parallel"),
            vmem_limit_bytes=32 * 1024 * 1024),
        cost_estimate=pl.CostEstimate(flops=flops, transcendentals=0,
                                      bytes_accessed=bytes_accessed),
    )(P, params["w"], params["scale"], params["bias"])
    return out.reshape(N, H, W, Cout)


def _bilinear_weights(f):
    """fill_up_weights bilinear kernel for ConvTranspose2d(kernel=2f)."""
    K = 2 * f
    fc = int(math.ceil(K / 2))
    c = (2 * fc - 1 - fc % 2) / (2.0 * fc)
    w = np.zeros((K, K), np.float32)
    for i in range(K):
        for j in range(K):
            w[i, j] = (1 - abs(i / fc - c)) * (1 - abs(j / fc - c))
    return w


def upsample_bilinear(x, f):
    """ConvTranspose2d(C, C, 2f, stride=f, pad=f//2, groups=C, bias=False).  x: NHWC bf16."""
    N, H, W, C = x.shape
    K = 2 * f
    pad = f // 2
    off = K - 1 - pad
    Hu = (H - 1) * f + 1 + 2 * off
    Wu = (W - 1) * f + 1 + 2 * off
    Ho = (H - 1) * f + K - 2 * pad
    Wo = (W - 1) * f + K - 2 * pad

    # Zero insertion + zero border in XLA (bf16 -> half the HBM bytes of the old
    # f32 version); weighted tap accumulation runs row-tiled inside the kernel.
    x_up = jnp.zeros((N, Hu, Wu, C), x.dtype)
    x_up = x_up.at[:, off:off + (H - 1) * f + 1:f,
                   off:off + (W - 1) * f + 1:f, :].set(x)

    kern = _bilinear_weights(f)[::-1, ::-1]   # flip for transposed-conv equivalence
    taps = [(ky, kx, float(kern[ky, kx])) for ky in range(K) for kx in range(K)]

    TYo = min(Ho, 16)
    while Ho % TYo:
        TYo -= 1
    grid = (N, Ho // TYo)
    kernel = functools.partial(_upsample_bilinear_kernel,
                               TYo=TYo, Wo=Wo, K=K, taps=taps)

    return pl.pallas_call(
        kernel,
        out_shape=jax.ShapeDtypeStruct((N, Ho, Wo, C), jnp.bfloat16),
        grid=grid,
        in_specs=[pl.BlockSpec((1, Hu, Wu, C), lambda n, t: (n, 0, 0, 0))],
        out_specs=pl.BlockSpec((1, TYo, Wo, C), lambda n, t: (n, t, 0, 0)),
        compiler_params=pltpu.CompilerParams(
            dimension_semantics=("parallel", "parallel"),
            vmem_limit_bytes=32 * 1024 * 1024),
    )(x_up)


# ----------------------------------------------------------------------------
# Pure-JAX reference (for self-check); same bf16 operand semantics as the kernels
# ----------------------------------------------------------------------------
def ref_deform_conv(x, params, residual=None):
    if residual is not None:
        x = x + residual
    y = lax.conv_general_dilated(
        x, params["w"], window_strides=(1, 1), padding=((1, 1), (1, 1)),
        dimension_numbers=("NHWC", "HWIO", "NHWC"),
        preferred_element_type=jnp.float32)
    y = y * params["scale"][0] + params["bias"][0]
    return jnp.maximum(y, 0.0).astype(jnp.bfloat16)


def ref_upsample(x, f):
    K = 2 * f
    pad = f // 2
    C = x.shape[-1]
    kern = jnp.asarray(_bilinear_weights(f)[::-1, ::-1], jnp.float32)
    rhs = jnp.broadcast_to(kern[:, :, None, None], (K, K, 1, C))
    y = lax.conv_general_dilated(
        x.astype(jnp.float32), rhs, window_strides=(1, 1),
        padding=((K - 1 - pad, K - 1 - pad), (K - 1 - pad, K - 1 - pad)),
        lhs_dilation=(f, f),
        dimension_numbers=("NHWC", "HWIO", "NHWC"),
        feature_group_count=C)
    return y.astype(jnp.bfloat16)


# ----------------------------------------------------------------------------
# Parameter construction (deterministic, synthetic)
# ----------------------------------------------------------------------------
def make_deform_conv_params(key, chi, cho):
    kw, kb, kg, kbe = jax.random.split(key, 4)
    w = jax.random.normal(kw, (3, 3, chi, cho), jnp.float32) / math.sqrt(9 * chi)
    conv_b = 0.1 * jax.random.normal(kb, (cho,), jnp.float32)
    gamma = 1.0 + 0.1 * jax.random.normal(kg, (cho,), jnp.float32)
    beta = 0.1 * jax.random.normal(kbe, (cho,), jnp.float32)
    running_mean = jnp.zeros((cho,), jnp.float32)
    running_var = jnp.ones((cho,), jnp.float32)
    eps = 1e-5
    scale = gamma / jnp.sqrt(running_var + eps)
    bias = beta + scale * (conv_b - running_mean)
    return {
        "w": w.astype(jnp.bfloat16),          # HWIO, bf16 for the MXU
        "scale": scale.reshape(1, cho),
        "bias": bias.reshape(1, cho),
    }


def build_ida(key, o, channels, up_f):
    ida = {}
    for i in range(1, len(channels)):
        c = channels[i]
        f = int(up_f[i])
        key, k1, k2 = jax.random.split(key, 3)
        ida["proj_%d" % i] = make_deform_conv_params(k1, c, o)
        ida["node_%d" % i] = make_deform_conv_params(k2, o, o)
        ida["up_f_%d" % i] = f
    return ida


def build_dla_up(key, startp, channels, scales, in_channels=None):
    channels = list(channels)
    in_channels = list(channels) if in_channels is None else list(in_channels)
    scales = np.array(scales, dtype=int)
    idas = []
    for i in range(len(channels) - 1):
        j = -i - 2
        key, sub = jax.random.split(key)
        idas.append(build_ida(sub, channels[j], in_channels[j:],
                              list(scales[j:] // scales[j])))
        scales[j + 1:] = scales[j]
        in_channels[j + 1:] = [channels[j] for _ in channels[j + 1:]]
    return {"startp": startp, "idas": idas}


# ----------------------------------------------------------------------------
# Forward passes (mirror PyTorch IDAUp / DLAUp control flow exactly)
# ----------------------------------------------------------------------------
def ida_forward(ida, layers, startp, endp, conv_fn, up_fn):
    for i in range(startp + 1, endp):
        idx = i - startp
        layers[i] = up_fn(conv_fn(layers[i], ida["proj_%d" % idx]),
                          ida["up_f_%d" % idx])
        # residual add fused into the node-conv input path
        layers[i] = conv_fn(layers[i], ida["node_%d" % idx],
                            residual=layers[i - 1])


def dla_up_forward(params, layers, conv_fn, up_fn):
    layers = list(layers)
    out = [layers[-1]]
    for i in range(len(layers) - params["startp"] - 1):
        ida_forward(params["idas"][i], layers,
                    len(layers) - i - 2, len(layers), conv_fn, up_fn)
        out.insert(0, layers[-1])
    return out


# ----------------------------------------------------------------------------
if __name__ == "__main__":
    key = jax.random.PRNGKey(0)
    startp = 0
    channels = [4, 8, 16]
    scales = [1, 2, 4]
    N, H0 = 2, 32

    kin, kparams = jax.random.split(key)
    # Inputs in NCHW (PyTorch convention), one feature map per DLA level.
    layers_nchw = []
    for c, s in zip(channels, scales):
        kin, kx = jax.random.split(kin)
        layers_nchw.append(jax.random.normal(kx, (N, c, H0 // s, H0 // s),
                                             jnp.float32))

    params = build_dla_up(kparams, startp, channels, scales)

    # layout: NCHW -> NHWC (channels on the 128-lane axis), activations in bf16.
    layers_nhwc = [jnp.transpose(x, (0, 2, 3, 1)).astype(jnp.bfloat16)
                   for x in layers_nchw]

    out_nhwc = dla_up_forward(params, layers_nhwc, conv3x3_bn_relu,
                              upsample_bilinear)
    out_nchw = [jnp.transpose(x.astype(jnp.float32), (0, 3, 1, 2))
                for x in out_nhwc]
    out_nchw = jax.block_until_ready(out_nchw)

    # Self-check against a pure-JAX (lax.conv) reference with the same bf16 semantics.
    ref_nhwc = dla_up_forward(params, layers_nhwc, ref_deform_conv, ref_upsample)
    ref_nchw = [jnp.transpose(x.astype(jnp.float32), (0, 3, 1, 2))
                for x in ref_nhwc]
    for a, b in zip(out_nchw, ref_nchw):
        np.testing.assert_allclose(np.asarray(a), np.asarray(b),
                                   rtol=2e-2, atol=2e-2)

    print("KERNEL_OK")
</pallas_src>

<mosaic_0001>
module attributes {stable_mosaic.version = 11 : i64} {
  func.func @_conv3x3_bn_relu_kernel(%arg0: i32, %arg1: i32, %arg2: memref<1x82x16xbf16, #tpu.memory_space<vmem>>, %arg3: memref<3x3x16x8xbf16, #tpu.memory_space<vmem>>, %arg4: memref<1x8xf32, #tpu.memory_space<vmem>>, %arg5: memref<1x8xf32, #tpu.memory_space<vmem>>, %arg6: memref<1x64x8xbf16, #tpu.memory_space<vmem>>) attributes {dimension_semantics = [#tpu.dimension_semantics<parallel>, #tpu.dimension_semantics<parallel>], iteration_bounds = array<i64: 2, 1>, scalar_prefetch = 0 : i64, scratch_operands = 0 : i64, tpu.core_type = #tpu.core_type<tc>, window_params = [{transform_indices = @transform_0, window_bounds = array<i64: 1, 82, 16>}, {pipeline_mode = #tpu.pipeline_mode<synchronous>, transform_indices = @transform_1, window_bounds = array<i64: 3, 3, 16, 8>}, {pipeline_mode = #tpu.pipeline_mode<synchronous>, transform_indices = @transform_2, window_bounds = array<i64: 1, 8>}, {pipeline_mode = #tpu.pipeline_mode<synchronous>, transform_indices = @transform_3, window_bounds = array<i64: 1, 8>}, {transform_indices = @transform_4, window_bounds = array<i64: 1, 64, 8>}]} {
    %c64_i32 = arith.constant 64 : i32
    %0 = arith.muli %arg1, %c64_i32 : i32
    %1 = tpu.assume_multiple %0, 16 : i32
    %c0 = arith.constant 0 : index
    %2 = arith.index_cast %1 : i32 to index
    %c0_0 = arith.constant 0 : index
    %3 = vector.load %arg2[%c0, %2, %c0_0] : memref<1x82x16xbf16, #tpu.memory_space<vmem>>, vector<1x82x16xbf16>
    %4 = vector.shape_cast %3 : vector<1x82x16xbf16> to vector<82x16xbf16>
    %5 = tpu.iota {dimensions = array<i32: 0>} : vector<64x1xi32>
    %c8_i32 = arith.constant 8 : i32
    %c0_i32 = arith.constant 0 : i32
    %6 = arith.cmpi eq, %c8_i32, %c0_i32 : i32
    %c1_i32 = arith.constant 1 : i32
    %7 = arith.select %6, %c1_i32, %c8_i32 : i32
    %8 = vector.broadcast %7 : i32 to vector<64x1xi32>
    %9 = arith.remsi %5, %8 : vector<64x1xi32>
    %c0_i32_1 = arith.constant 0 : i32
    %10 = vector.broadcast %c0_i32_1 : i32 to vector<64x1xi32>
    %11 = arith.cmpi ne, %9, %10 : vector<64x1xi32>
    %c0_i32_2 = arith.constant 0 : i32
    %12 = vector.broadcast %c0_i32_2 : i32 to vector<64x1xi32>
    %13 = arith.cmpi slt, %9, %12 : vector<64x1xi32>
    %c0_i32_3 = arith.constant 0 : i32
    %14 = arith.cmpi slt, %7, %c0_i32_3 : i32
    %15 = vector.broadcast %14 : i1 to vector<64x1xi1>
    %16 = vector.broadcast %15 : vector<64x1xi1> to vector<64x1xi1>
    %17 = arith.xori %13, %16 : vector<64x1xi1>
    %18 = arith.andi %17, %11 : vector<64x1xi1>
    %19 = vector.broadcast %7 : i32 to vector<64x1xi32>
    %20 = arith.addi %9, %19 : vector<64x1xi32>
    %21 = arith.select %18, %20, %9 : vector<64x1xi1>, vector<64x1xi32>
    %c0_i32_4 = arith.constant 0 : i32
    %22 = vector.broadcast %c0_i32_4 : i32 to vector<64x1xi32>
    %23 = arith.cmpi ne, %21, %22 : vector<64x1xi32>
    %c7_i32 = arith.constant 7 : i32
    %24 = vector.broadcast %c7_i32 : i32 to vector<64x1xi32>
    %25 = arith.cmpi ne, %21, %24 : vector<64x1xi32>
    %cst = arith.constant 0.000000e+00 : f32
    %26 = vector.broadcast %cst : f32 to vector<64x8xf32>
    %27 = vector.extract_strided_slice %4 {offsets = [0, 0], sizes = [64, 16], strides = [1, 1]} : vector<82x16xbf16> to vector<64x16xbf16>
    %cst_5 = arith.constant 0.000000e+00 : bf16
    %28 = vector.broadcast %cst_5 : bf16 to vector<64x16xbf16>
    %29 = vector.shape_cast %23 : vector<64x1xi1> to vector<64x1xi1>
    %30 = vector.broadcast %29 : vector<64x1xi1> to vector<64x16xi1>
    %31 = arith.select %30, %27, %28 : vector<64x16xi1>, vector<64x16xbf16>
    %c0_6 = arith.constant 0 : index
    %c0_7 = arith.constant 0 : index
    %c0_8 = arith.constant 0 : index
    %c0_9 = arith.constant 0 : index
    %32 = vector.load %arg3[%c0_6, %c0_7, %c0_8, %c0_9] : memref<3x3x16x8xbf16, #tpu.memory_space<vmem>>, vector<1x1x16x8xbf16>
    %33 = vector.shape_cast %32 : vector<1x1x16x8xbf16> to vector<16x8xbf16>
    %cst_10 = arith.constant dense<0.000000e+00> : vector<64x8xf32>
    %34 = tpu.matmul %31, %33, %cst_10 {dimension_numbers = #tpu.dot_dimension_numbers<[1], [0], [0], [1], [0, 0, 1, 1], [], []>} : vector<64x16xbf16>, vector<16x8xbf16>, vector<64x8xf32> -> vector<64x8xf32>
    %35 = arith.addf %26, %34 : vector<64x8xf32>
    %36 = vector.extract_strided_slice %4 {offsets = [1, 0], sizes = [64, 16], strides = [1, 1]} : vector<82x16xbf16> to vector<64x16xbf16>
    %c0_11 = arith.constant 0 : index
    %c1 = arith.constant 1 : index
    %c0_12 = arith.constant 0 : index
    %c0_13 = arith.constant 0 : index
    %37 = vector.load %arg3[%c0_11, %c1, %c0_12, %c0_13] : memref<3x3x16x8xbf16, #tpu.memory_space<vmem>>, vector<1x1x16x8xbf16>
    %38 = vector.shape_cast %37 : vector<1x1x16x8xbf16> to vector<16x8xbf16>
    %cst_14 = arith.constant dense<0.000000e+00> : vector<64x8xf32>
    %39 = tpu.matmul %36, %38, %cst_14 {dimension_numbers = #tpu.dot_dimension_numbers<[1], [0], [0], [1], [0, 0, 1, 1], [], []>} : vector<64x16xbf16>, vector<16x8xbf16>, vector<64x8xf32> -> vector<64x8xf32>
    %40 = arith.addf %35, %39 : vector<64x8xf32>
    %41 = vector.extract_strided_slice %4 {offsets = [2, 0], sizes = [64, 16], strides = [1, 1]} : vector<82x16xbf16> to vector<64x16xbf16>
    %cst_15 = arith.constant 0.000000e+00 : bf16
    %42 = vector.broadcast %cst_15 : bf16 to vector<64x16xbf16>
    %43 = vector.shape_cast %25 : vector<64x1xi1> to vector<64x1xi1>
    %44 = vector.broadcast %43 : vector<64x1xi1> to vector<64x16xi1>
    %45 = arith.select %44, %41, %42 : vector<64x16xi1>, vector<64x16xbf16>
    %c0_16 = arith.constant 0 : index
    %c2 = arith.constant 2 : index
    %c0_17 = arith.constant 0 : index
    %c0_18 = arith.constant 0 : index
    %46 = vector.load %arg3[%c0_16, %c2, %c0_17, %c0_18] : memref<3x3x16x8xbf16, #tpu.memory_space<vmem>>, vector<1x1x16x8xbf16>
    %47 = vector.shape_cast %46 : vector<1x1x16x8xbf16> to vector<16x8xbf16>
    %cst_19 = arith.constant dense<0.000000e+00> : vector<64x8xf32>
    %48 = tpu.matmul %45, %47, %cst_19 {dimension_numbers = #tpu.dot_dimension_numbers<[1], [0], [0], [1], [0, 0, 1, 1], [], []>} : vector<64x16xbf16>, vector<16x8xbf16>, vector<64x8xf32> -> vector<64x8xf32>
    %49 = arith.addf %40, %48 : vector<64x8xf32>
    %50 = vector.extract_strided_slice %4 {offsets = [8, 0], sizes = [64, 16], strides = [1, 1]} : vector<82x16xbf16> to vector<64x16xbf16>
    %cst_20 = arith.constant 0.000000e+00 : bf16
    %51 = vector.broadcast %cst_20 : bf16 to vector<64x16xbf16>
    %52 = vector.shape_cast %23 : vector<64x1xi1> to vector<64x1xi1>
    %53 = vector.broadcast %52 : vector<64x1xi1> to vector<64x16xi1>
    %54 = arith.select %53, %50, %51 : vector<64x16xi1>, vector<64x16xbf16>
    %c1_21 = arith.constant 1 : index
    %c0_22 = arith.constant 0 : index
    %c0_23 = arith.constant 0 : index
    %c0_24 = arith.constant 0 : index
    %55 = vector.load %arg3[%c1_21, %c0_22, %c0_23, %c0_24] : memref<3x3x16x8xbf16, #tpu.memory_space<vmem>>, vector<1x1x16x8xbf16>
    %56 = vector.shape_cast %55 : vector<1x1x16x8xbf16> to vector<16x8xbf16>
    %cst_25 = arith.constant dense<0.000000e+00> : vector<64x8xf32>
    %57 = tpu.matmul %54, %56, %cst_25 {dimension_numbers = #tpu.dot_dimension_numbers<[1], [0], [0], [1], [0, 0, 1, 1], [], []>} : vector<64x16xbf16>, vector<16x8xbf16>, vector<64x8xf32> -> vector<64x8xf32>
    %58 = arith.addf %49, %57 : vector<64x8xf32>
    %59 = vector.extract_strided_slice %4 {offsets = [9, 0], sizes = [64, 16], strides = [1, 1]} : vector<82x16xbf16> to vector<64x16xbf16>
    %c1_26 = arith.constant 1 : index
    %c1_27 = arith.constant 1 : index
    %c0_28 = arith.constant 0 : index
    %c0_29 = arith.constant 0 : index
    %60 = vector.load %arg3[%c1_26, %c1_27, %c0_28, %c0_29] : memref<3x3x16x8xbf16, #tpu.memory_space<vmem>>, vector<1x1x16x8xbf16>
    %61 = vector.shape_cast %60 : vector<1x1x16x8xbf16> to vector<16x8xbf16>
    %cst_30 = arith.constant dense<0.000000e+00> : vector<64x8xf32>
    %62 = tpu.matmul %59, %61, %cst_30 {dimension_numbers = #tpu.dot_dimension_numbers<[1], [0], [0], [1], [0, 0, 1, 1], [], []>} : vector<64x16xbf16>, vector<16x8xbf16>, vector<64x8xf32> -> vector<64x8xf32>
    %63 = arith.addf %58, %62 : vector<64x8xf32>
    %64 = vector.extract_strided_slice %4 {offsets = [10, 0], sizes = [64, 16], strides = [1, 1]} : vector<82x16xbf16> to vector<64x16xbf16>
    %cst_31 = arith.constant 0.000000e+00 : bf16
    %65 = vector.broadcast %cst_31 : bf16 to vector<64x16xbf16>
    %66 = vector.shape_cast %25 : vector<64x1xi1> to vector<64x1xi1>
    %67 = vector.broadcast %66 : vector<64x1xi1> to vector<64x16xi1>
    %68 = arith.select %67, %64, %65 : vector<64x16xi1>, vector<64x16xbf16>
    %c1_32 = arith.constant 1 : index
    %c2_33 = arith.constant 2 : index
    %c0_34 = arith.constant 0 : index
    %c0_35 = arith.constant 0 : index
    %69 = vector.load %arg3[%c1_32, %c2_33, %c0_34, %c0_35] : memref<3x3x16x8xbf16, #tpu.memory_space<vmem>>, vector<1x1x16x8xbf16>
    %70 = vector.shape_cast %69 : vector<1x1x16x8xbf16> to vector<16x8xbf16>
    %cst_36 = arith.constant dense<0.000000e+00> : vector<64x8xf32>
    %71 = tpu.matmul %68, %70, %cst_36 {dimension_numbers = #tpu.dot_dimension_numbers<[1], [0], [0], [1], [0, 0, 1, 1], [], []>} : vector<64x16xbf16>, vector<16x8xbf16>, vector<64x8xf32> -> vector<64x8xf32>
    %72 = arith.addf %63, %71 : vector<64x8xf32>
    %73 = vector.extract_strided_slice %4 {offsets = [16, 0], sizes = [64, 16], strides = [1, 1]} : vector<82x16xbf16> to vector<64x16xbf16>
    %cst_37 = arith.constant 0.000000e+00 : bf16
    %74 = vector.broadcast %cst_37 : bf16 to vector<64x16xbf16>
    %75 = vector.shape_cast %23 : vector<64x1xi1> to vector<64x1xi1>
    %76 = vector.broadcast %75 : vector<64x1xi1> to vector<64x16xi1>
    %77 = arith.select %76, %73, %74 : vector<64x16xi1>, vector<64x16xbf16>
    %c2_38 = arith.constant 2 : index
    %c0_39 = arith.constant 0 : index
    %c0_40 = arith.constant 0 : index
    %c0_41 = arith.constant 0 : index
    %78 = vector.load %arg3[%c2_38, %c0_39, %c0_40, %c0_41] : memref<3x3x16x8xbf16, #tpu.memory_space<vmem>>, vector<1x1x16x8xbf16>
    %79 = vector.shape_cast %78 : vector<1x1x16x8xbf16> to vector<16x8xbf16>
    %cst_42 = arith.constant dense<0.000000e+00> : vector<64x8xf32>
    %80 = tpu.matmul %77, %79, %cst_42 {dimension_numbers = #tpu.dot_dimension_numbers<[1], [0], [0], [1], [0, 0, 1, 1], [], []>} : vector<64x16xbf16>, vector<16x8xbf16>, vector<64x8xf32> -> vector<64x8xf32>
    %81 = arith.addf %72, %80 : vector<64x8xf32>
    %82 = vector.extract_strided_slice %4 {offsets = [17, 0], sizes = [64, 16], strides = [1, 1]} : vector<82x16xbf16> to vector<64x16xbf16>
    %c2_43 = arith.constant 2 : index
    %c1_44 = arith.constant 1 : index
    %c0_45 = arith.constant 0 : index
    %c0_46 = arith.constant 0 : index
    %83 = vector.load %arg3[%c2_43, %c1_44, %c0_45, %c0_46] : memref<3x3x16x8xbf16, #tpu.memory_space<vmem>>, vector<1x1x16x8xbf16>
    %84 = vector.shape_cast %83 : vector<1x1x16x8xbf16> to vector<16x8xbf16>
    %cst_47 = arith.constant dense<0.000000e+00> : vector<64x8xf32>
    %85 = tpu.matmul %82, %84, %cst_47 {dimension_numbers = #tpu.dot_dimension_numbers<[1], [0], [0], [1], [0, 0, 1, 1], [], []>} : vector<64x16xbf16>, vector<16x8xbf16>, vector<64x8xf32> -> vector<64x8xf32>
    %86 = arith.addf %81, %85 : vector<64x8xf32>
    %87 = vector.extract_strided_slice %4 {offsets = [18, 0], sizes = [64, 16], strides = [1, 1]} : vector<82x16xbf16> to vector<64x16xbf16>
    %cst_48 = arith.constant 0.000000e+00 : bf16
    %88 = vector.broadcast %cst_48 : bf16 to vector<64x16xbf16>
    %89 = vector.shape_cast %25 : vector<64x1xi1> to vector<64x1xi1>
    %90 = vector.broadcast %89 : vector<64x1xi1> to vector<64x16xi1>
    %91 = arith.select %90, %87, %88 : vector<64x16xi1>, vector<64x16xbf16>
    %c2_49 = arith.constant 2 : index
    %c2_50 = arith.constant 2 : index
    %c0_51 = arith.constant 0 : index
    %c0_52 = arith.constant 0 : index
    %92 = vector.load %arg3[%c2_49, %c2_50, %c0_51, %c0_52] : memref<3x3x16x8xbf16, #tpu.memory_space<vmem>>, vector<1x1x16x8xbf16>
    %93 = vector.shape_cast %92 : vector<1x1x16x8xbf16> to vector<16x8xbf16>
    %cst_53 = arith.constant dense<0.000000e+00> : vector<64x8xf32>
    %94 = tpu.matmul %91, %93, %cst_53 {dimension_numbers = #tpu.dot_dimension_numbers<[1], [0], [0], [1], [0, 0, 1, 1], [], []>} : vector<64x16xbf16>, vector<16x8xbf16>, vector<64x8xf32> -> vector<64x8xf32>
    %95 = arith.addf %86, %94 : vector<64x8xf32>
    %c0_54 = arith.constant 0 : index
    %c0_55 = arith.constant 0 : index
    %96 = vector.load %arg4[%c0_54, %c0_55] : memref<1x8xf32, #tpu.memory_space<vmem>>, vector<1x8xf32>
    %97 = vector.broadcast %96 : vector<1x8xf32> to vector<64x8xf32>
    %98 = arith.mulf %95, %97 : vector<64x8xf32>
    %c0_56 = arith.constant 0 : index
    %c0_57 = arith.constant 0 : index
    %99 = vector.load %arg5[%c0_56, %c0_57] : memref<1x8xf32, #tpu.memory_space<vmem>>, vector<1x8xf32>
    %100 = vector.broadcast %99 : vector<1x8xf32> to vector<64x8xf32>
    %101 = arith.addf %98, %100 : vector<64x8xf32>
    %cst_58 = arith.constant 0.000000e+00 : f32
    %102 = vector.broadcast %cst_58 : f32 to vector<64x8xf32>
    %103 = arith.maximumf %101, %102 : vector<64x8xf32>
    %104 = arith.truncf %103 : vector<64x8xf32> to vector<64x8xbf16>
    %c0_59 = arith.constant 0 : index
    %c0_60 = arith.constant 0 : index
    %c0_61 = arith.constant 0 : index
    %105 = vector.load %arg6[%c0_59, %c0_60, %c0_61] : memref<1x64x8xbf16, #tpu.memory_space<vmem>>, vector<1x64x8xbf16>
    %106 = vector.shape_cast %105 : vector<1x64x8xbf16> to vector<64x8xbf16>
    %107 = vector.shape_cast %104 : vector<64x8xbf16> to vector<1x64x8xbf16>
    tpu.vector_store %arg6[%c0_59, %c0_60, %c0_61], %107 {strides = array<i32>} : memref<1x64x8xbf16, #tpu.memory_space<vmem>>, vector<1x64x8xbf16>,
    return
  }
  func.func @transform_0(%arg0: i32, %arg1: i32) -> (i32, i32, i32) {
    %c0_i32 = arith.constant 0 : i32
    %c0_i32_0 = arith.constant 0 : i32
    %c0_i32_1 = arith.constant 0 : i32
    return %arg0, %c0_i32, %c0_i32_0 : i32, i32, i32
  }
  func.func @transform_1(%arg0: i32, %arg1: i32) -> (i32, i32, i32, i32) {
    %c0_i32 = arith.constant 0 : i32
    %c0_i32_0 = arith.constant 0 : i32
    %c0_i32_1 = arith.constant 0 : i32
    %c0_i32_2 = arith.constant 0 : i32
    %c0_i32_3 = arith.constant 0 : i32
    return %c0_i32, %c0_i32_0, %c0_i32_1, %c0_i32_2 : i32, i32, i32, i32
  }
  func.func @transform_2(%arg0: i32, %arg1: i32) -> (i32, i32) {
    %c0_i32 = arith.constant 0 : i32
    %c0_i32_0 = arith.constant 0 : i32
    %c0_i32_1 = arith.constant 0 : i32
    return %c0_i32, %c0_i32_0 : i32, i32
  }
  func.func @transform_3(%arg0: i32, %arg1: i32) -> (i32, i32) {
    %c0_i32 = arith.constant 0 : i32
    %c0_i32_0 = arith.constant 0 : i32
    %c0_i32_1 = arith.constant 0 : i32
    return %c0_i32, %c0_i32_0 : i32, i32
  }
  func.func @transform_4(%arg0: i32, %arg1: i32) -> (i32, i32, i32) {
    %c0_i32 = arith.constant 0 : i32
    %c0_i32_0 = arith.constant 0 : i32
    return %arg0, %arg1, %c0_i32 : i32, i32, i32
  }
}

</mosaic_0001>

<bundles_post_ra>
// kernel: tpu_custom_call.1
= control target key start
LH: loop header
LB: loop body
LE: loop exit
PB: predicated region body
PF: predicated region fallthrough
CT: control target
= control target key end

     0   :  { %s2193_s15 = smov 0   ;;  %s2195_s16 = smov 0   ;;  %s2756_s0 = inlined_call_operand.vmem [shape: bf16[2,82,16], index: 0, kind: input, shape index: {}]   ;;  %s2757_s1 = inlined_call_operand.vmem [shape: bf16[3,3,16,8], index: 1, kind: input, shape index: {}]   ;;  %s2758_s2 = inlined_call_operand.vmem [shape: f32[1,8], index: 2, kind: input, shape index: {}]   ;;  %s2759_s3 = inlined_call_operand.vmem [shape: f32[1,8], index: 3, kind: input, shape index: {}]   ;;  %s2760_s4 = inlined_call_operand.vmem [shape: bf16[2,64,8], index: 4, kind: output, shape index: {}]  }
   0x1   :  { %s2197_s17 = smov 0  }
   0x2 LB: > { %s26_s18 = sadd.s32 1, %s2161_s16  ;;  %p1770_p0 = scmp.ge.s32.totalorder %s2165_s17, 1  ;;  %s2165_s17 = sphi %s2197_s17, %s14_s17   ;;  %s2161_s16 = sphi %s2195_s16, %s2822_s16   ;;  %s2157_s15 = sphi %s2193_s15, %s2821_s15  }
   0x3   : > { %p28_p1 = scmp.ge.s32.totalorder %s26_s18, 2  ;;  %p176_p2 = scmp.lt.s32.totalorder %s2165_s17, 3 }
   0x5   : > { %s2824_s18 = smov (%p28_p1, %s26_s18), 0  ;;  %p177_p3 = pnand %p1770_p0, %p176_p2 }
   0x6   : > { %v2122_v0 = vld [vmem:[%s2757_s1 + $0x8] sm:$0xff] (!%p177_p3)   ;;  %p206_p4 = scmp.lt.s32.totalorder (!%p177_p3), %s2157_s15, 1  ;;  %v240_v1 = vlaneseq (!%p177_p3)  ;;  %v2217_v2 = vld [vmem:[%s2757_s1 + $0x20] sm:$0xff] (!%p177_p3)   ;;  %vm2761_vm0 = vsmask.f32 (!%p177_p3), 7424  ;;  %vm464_vm1 = vcmask (!%p177_p3), 130048  }
   0x7   : > { %180 = sbr.rel (%p177_p3) target bundleno = 336 (0x150), region = 36  ;;  %1940 = vmatprep.subr.bf16.mxu1 (!%p177_p3), %v2122_v0  ;;  %v2224_v3 = vld [vmem:[%s2757_s1] sm:$0xff] (!%p177_p3)   ;;  %1980 = vmatprep.subr.bf16.mxu0 (!%p177_p3), %v2217_v2  ;;  %v2233_v4 = vld [vmem:[%s2757_s1 + $0x28] sm:$0xff] (!%p177_p3)   ;;  %vm677_vm2 = vcmask (!%p177_p3), 1040384   ;;  %vm678_vm3 = vcmask (!%p177_p3), 1044484   ;;  %v2311_v56 = vld [vmem:[%s2757_s1 + $0x30] sm:$0xff] (!%p177_p3)  }
   0x8   : > { %1941 = vmatpush3.bf16.msra.mxu1 (!%p177_p3), %v2122_v0  ;;  %1981 = vmatpush3.bf16.msra.mxu0 (!%p177_p3), %v2217_v2  ;;  %v2235_v5 = vshrl.u32 (!%p177_p3), %v240_v1, 7  ;;  %v2316_v57 = vld [vmem:[%s2757_s1 + $0x10] sm:$0xff] (!%p177_p3)   ;;  %vm2334_vm5 = vmor (!%p177_p3), %vm677_vm2, %vm678_vm3  ;;  %vm2767_vm3 = vcmask (!%p177_p3), 1046528  }
   0x9   : > { %1950 = vmatprep.subr.bf16.mxu1 (!%p177_p3), %v2224_v3  ;;  %1990 = vmatprep.subr.bf16.mxu0 (!%p177_p3), %v2233_v4 }
   0xa   : > { %v2244_v6 = vadd.s32 (!%p177_p3), 8, %v2235_v5  ;;  %v2247_v7 = vadd.s32 (!%p177_p3), 16, %v2235_v5  ;;  %v2250_v8 = vadd.s32 (!%p177_p3), 24, %v2235_v5  ;;  %v253_v22 = vand.u32 (!%p177_p3), 7, %v2235_v5 }
   0xc   : > { %v260_v59 = vand.u32 (!%p177_p3), 7, %v2244_v6  ;;  %v267_v60 = vand.u32 (!%p177_p3), 7, %v2247_v7  ;;  %v274_v61 = vand.u32 (!%p177_p3), 7, %v2250_v8  ;;  %vm353_vm4 = vcmp.ne.s32.totalorder (!%p177_p3), %v253_v22, 7 }
   0xd   : > { %vm661_vm9 = vmpackc.low (!%p177_p3), %vm353_vm4, %vm353_vm4  ;;  %v2352_v7 = vadd.s32 (!%p177_p3), 32, %v2235_v5  ;;  %vm2361_vm11 = vcmp.ne.s32.totalorder (!%p177_p3), %v253_v22, 0 }
   0xe   : > { %s2826_s15 = smov (!%p206_p4, %s2157_s15), 1  ;;  %vm354_vm6 = vcmp.ne.s32.totalorder %v260_v59, 7  ;;  %vm2341_vm7 = vcmp.ne.s32.totalorder %v267_v60, 7  ;;  %vm2347_vm8 = vcmp.ne.s32.totalorder %v274_v61, 7  ;;  %vm2371_vm13 = vcmp.ne.s32.totalorder %v260_v59, 0  ;;  %vm2392_vm4 = vmpackc.low %vm2361_vm11, %vm2361_vm11 }
   0xf   : > { %s2096_s25 = smul.u32 44, %s2826_s15  ;;  %vm662_vm10 = vmpackc.low %vm354_vm6, %vm354_vm6  ;;  %vm2380_vm15 = vcmp.ne.s32.totalorder %v267_v60, 0  ;;  %s1886_s23 = sshll.u32 %s2826_s15, 5 }
  0x10   : > { %vm663_vm12 = vmpackc.low %vm2341_vm7, %vm2341_vm7  ;;  %s2729_s26 = scalar_lea.vmem %s2760_s4, %s1886_s23 }
  0x11   : > { %s2240_s30 = scalar_lea.vmem %s2756_s0, %s2096_s25  ;;  %vm664_vm14 = vmpackc.low %vm2347_vm8, %vm2347_vm8 }
  0x12   : > { %v2253_v9 = vld [vmem:[%s2240_s30] sm:$0xf]  ;;  %v2256_v10 = vld [vmem:[%s2240_s30 + $0x4] sm:$0xf]  ;;  %v2259_v11 = vld [vmem:[%s2240_s30 + $0x8] sm:$0xf] }
  0x13   : > { %v2262_v12 = vld [vmem:[%s2240_s30 + $0xc] sm:$0xf]  ;;  %v1776_v13 = vcombine.low %v2253_v9, %v2256_v10  ;;  %v2267_v14 = vld [vmem:[%s2240_s30 + $0x10] sm:$0xf]  ;;  %v1820_v15 = vcombine.low %v2256_v10, %v2259_v11  ;;  %v2272_v16 = vld [vmem:[%s2240_s30 + $0x14] sm:$0xf] }
  0x14   : > { %v1777_v17 = vcombine.low %v2259_v11, %v2262_v12  ;;  %v1821_v18 = vcombine.low %v2262_v12, %v2267_v14  ;;  %v1778_v19 = vcombine.low %v2267_v14, %v2272_v16  ;;  %v2281_v20 = vld [vmem:[%s2240_s30 + $0x18] sm:$0xf]  ;;  %v2284_v21 = vld [vmem:[%s2240_s30 + $0x1c] sm:$0xf]  ;;  %v2292_v35 = vld [vmem:[%s2240_s30 + $0x20] sm:$0xf] }
  0x15   : > { %v423_v23 = vshrl.u32 %v1776_v13, 16  ;;  %v425_v24 = vshll.u32 %v1776_v13, 16  ;;  %v981_v25 = vshrl.u32 %v1820_v15, 16  ;;  %v983_v26 = vshll.u32 %v1820_v15, 16  ;;  %vm2404_vm7 = vmpackc.low %vm2371_vm13, %vm2371_vm13 }
  0x16   : > { %v430_v27 = vshll.u32 %v1777_v17, 16  ;;  %v434_v28 = vshrl.u32 %v1777_v17, 16  ;;  %v988_v29 = vshll.u32 %v1821_v18, 16  ;;  %v992_v30 = vshrl.u32 %v1821_v18, 16 }
  0x17   : > { %v427_v31 = vrot.slane %v425_v24, 1  ;;  %v985_v32 = vrot.slane %v983_v26, 1  ;;  %v438_v33 = vshll.u32 %v1778_v19, 16  ;;  %v2289_v34 = vcombine.low %v2272_v16, %v2281_v20 }
  0x18   : > { %v432_v36 = vrot.slane %v430_v27, 1  ;;  %v990_v37 = vrot.slane %v988_v29, 1  ;;  %v1779_v38 = vcombine.low %v2281_v20, %v2284_v21  ;;  %v442_v39 = vshrl.u32 %v1778_v19, 16 }
  0x19   : > { %v428_v40 = vor.u32 %v427_v31, %v423_v23  ;;  %v986_v41 = vor.u32 %v985_v32, %v981_v25  ;;  %v440_v42 = vrot.slane %v438_v33, 1  ;;  %v996_v43 = vshll.u32 %v2289_v34, 16  ;;  %v2475_v25 = vld [vmem:[%s2757_s1 + $0x18] sm:$0xff]  }
  0x1a   : > { %v436_v44 = vor.u32 %v434_v28, %v432_v36  ;;  %v994_v45 = vor.u32 %v992_v30, %v990_v37  ;;  %v446_v46 = vshll.u32 %v1779_v38, 16  ;;  %v1780_v47 = vcombine.low %v2292_v35, %v2292_v35 }
  0x1b   : > { %v433_v48 = vsel %vm2761_vm0, %v428_v40, %v432_v36  ;;  %v991_v49 = vsel %vm2761_vm0, %v986_v41, %v990_v37  ;;  %v2301_v50 = vrot.slane %v996_v43, 1  ;;  %v444_v51 = vor.u32 %v442_v39, %v440_v42 }
  0x1c   : > { %1942 = vmatprep.mubr.msk.bf16.mxu1 %vm464_vm1, %v433_v48  ;;  %1982 = vmatprep.mubr.msk.bf16.mxu0 %vm464_vm1, %v991_v49  ;;  %v2306_v52 = vsel %vm2761_vm0, %v436_v44, %v440_v42  ;;  %v448_v53 = vrot.slane %v446_v46, 1  ;;  %v450_v54 = vshrl.u32 %v1779_v38, 16  ;;  %v454_v55 = vshll.u32 %v1780_v47, 16 }
  0x1d   : > { %1943 = vmatmul.mubr.msk.bf16.vlgmr.msra.gmra.mrb[0].mxu1 %vm464_vm1, %v2306_v52  ;;  %v999_v58 = vsel %vm2761_vm0, %v994_v45, %v2301_v50  ;;  %v2167_v13 = vmov 0   ;;  %v2359_v17 = vadd.s32 40, %v2235_v5  ;;  %v281_v24 = vand.u32 7, %v2352_v7 }
  0x1e   : > { %1951 = vmatpush3.bf16.msra.mxu1 %v2224_v3  ;;  %1983 = vmatmul.mubr.msk.bf16.vlgmr.msra.gmra.mrb[0].mxu0 %vm464_vm1, %v999_v58  ;;  %v2328_v62 = vsel %vm2761_vm0, %v444_v51, %v448_v53  ;;  %v2330_v63 = vor.u32 %v450_v54, %v448_v53  ;;  %v456_v0 = vrot.slane %v454_v55, 1  ;;  %v669_v15 = vsel %vm661_vm9, 65537, %v2167_v13 }
  0x1f   : > { %1991 = vmatpush3.bf16.msra.mxu0 %v2233_v4  ;;  %1946 = vmatprep.mubr.msk.bf16.mxu1 %vm464_vm1, %v2328_v62  ;;  %v670_v19 = vsel %vm662_vm10, 65537, %v2167_v13  ;;  %v680_v23 = vrot.slane %v669_v15, 7  ;;  %v671_v22 = vsel %vm663_vm12, 65537, %v2167_v13  ;;  %v288_v27 = vand.u32 7, %v2359_v17 }
  0x20   : > { %v457_v4 = vsel %vm2761_vm0, %v2330_v63, %v456_v0  ;;  %2000 = vmatprep.subr.bf16.mxu0 %v2311_v56  ;;  %1960 = vmatprep.subr.bf16.mxu1 %v2316_v57  ;;  %v682_v26 = vrot.slane %v670_v19, 7  ;;  %v672_v29 = vsel %vm664_vm14, 65537, %v2167_v13  ;;  %v685_v31 = vrot.slane %v671_v22, 7  ;;  %vm2438_vm14 = vmpackc.low %vm2380_vm15, %vm2380_vm15 }
  0x21   : > { %v681_v30 = vrot.slane %v680_v23, 4  ;;  %vm2385_vm2 = vcmp.ne.s16.totalorder %v680_v23, 0  ;;  %v688_v37 = vrot.slane %v672_v29, 7  ;;  %vm357_vm6 = vcmp.ne.s32.totalorder %v281_v24, 7 }
  0x22   : > { %v684_v36 = vrot.slane %v682_v26, 4  ;;  %v1107_v38 = vsel %vm2385_vm2, %v2256_v10, 0  ;;  %v687_v41 = vrot.slane %v685_v31, 4  ;;  %vm358_vm8 = vcmp.ne.s32.totalorder %v288_v27, 7  ;;  %vm665_vm9 = vmpackc.low %vm357_vm6, %vm357_vm6 }
  0x23   : > { %v2411_v40 = vsel %vm2334_vm5, %v681_v30, %v682_v26  ;;  %v385_v42 = vsel %vm2392_vm4, %v2253_v9, 0  ;;  %v690_v44 = vrot.slane %v688_v37, 4  ;;  %vm666_vm11 = vmpackc.low %vm358_vm8, %vm358_vm8  ;;  %v673_v45 = vsel %vm665_vm9, 65537, %v2167_v13 }
  0x24   : > { %v2418_v43 = vsel %vm2334_vm5, %v684_v36, %v685_v31  ;;  %vm2766_vm10 = vcmp.ne.s16.totalorder %v2411_v40, 0  ;;  %v2424_v46 = vsel %vm2334_vm5, %v687_v41, %v688_v37  ;;  %v674_v48 = vsel %vm666_vm11, 65537, %v2167_v13  ;;  %v2510_v41 = vld [vmem:[%s2757_s1 + $0x38] sm:$0xff]  }
  0x25   : > { %1947 = vmatmul.mubr.msk.bf16.gmra.mrb[4].mxu1 %vm464_vm1, %v457_v4  ;;  %vm2765_vm12 = vcmp.ne.s16.totalorder %v2418_v43, 0  ;;  %v1108_v47 = vsel %vm2766_vm10, %v2259_v11, 0  ;;  %vm2764_vm13 = vcmp.ne.s16.totalorder %v2424_v46, 0  ;;  %v691_v53 = vrot.slane %v673_v45, 7 }
  0x26   : > { %v1109_v49 = vsel %vm2765_vm12, %v2262_v12, 0  ;;  %v1832_v51 = vcombine.low %v1107_v38, %v1108_v47  ;;  %v1110_v55 = vsel %vm2764_vm13, %v2267_v14, 0  ;;  %v694_v58 = vrot.slane %v674_v48, 7 }
  0x27   : > { %v386_v59 = vsel %vm2404_vm7, %v2256_v10, 0  ;;  %vm348_vm6 = vcmp.ne.s32.totalorder %v274_v61, 0  ;;  %v1833_v60 = vcombine.low %v1109_v49, %v1110_v55  ;;  %v2452_v3 = vsel %vm2334_vm5, %v690_v44, %v691_v53 }
  0x28   : > { %v1142_v0 = vrot.slane %v1832_v51, 1  ;;  %v693_v6 = vrot.slane %v691_v53, 4  ;;  %vm2454_vm15 = vmpackc.low %vm348_vm6, %vm348_vm6  ;;  %vm2762_vm8 = vcmp.ne.s16.totalorder %v2452_v3, 0  ;;  %v1786_v15 = vcombine.low %v385_v42, %v386_v59 }
  0x29   : > { %v387_v17 = vsel %vm2438_vm14, %v2259_v11, 0  ;;  %v388_v8 = vsel %vm2454_vm15, %v2262_v12, 0  ;;  %v1143_v61 = vrot.slane %v1833_v60, 1  ;;  %v1111_v19 = vsel %vm2762_vm8, %v2272_v16, 0 }
  0x2a   : > { %v2467_v18 = vsel %vm2334_vm5, %v693_v6, %v694_v58  ;;  %v1787_v23 = vcombine.low %v387_v17, %v388_v8  ;;  %1952 = vmatprep.mubr.msk.bf16.mxu1 %vm464_vm1, %v1786_v15  ;;  %v247_v22 = vadd.s32 48, %v2235_v5  ;;  %v248_v26 = vadd.s32 56, %v2235_v5  ;;  %v2552_v15 = vld [vmem:[%s2240_s30 + $0x24] sm:$0xf] }
  0x2b   : > { %vm2763_vm9 = vcmp.ne.s16.totalorder %v2467_v18, 0  ;;  %v1144_v28 = vsel %vm2767_vm3, %v1142_v0, %v1143_v61  ;;  %vm349_vm11 = vcmp.ne.s32.totalorder %v281_v24, 0  ;;  %vm350_vm6 = vcmp.ne.s32.totalorder %v288_v27, 0 }
  0x2c   : > { %v1112_v29 = vsel %vm2763_vm9, %v2281_v20, 0  ;;  %1992 = vmatprep.mubr.msk.bf16.mxu0 %vm464_vm1, %v1144_v28  ;;  %v295_v31 = vand.u32 7, %v247_v22  ;;  %v302_v36 = vand.u32 7, %v248_v26  ;;  %vm2490_vm0 = vmpackc.low %vm349_vm11, %vm349_vm11  ;;  %v696_v27 = vrot.slane %v694_v58, 4 }
  0x2d   : > { %1953 = vmatmul.mubr.msk.bf16.vlgmr.msra.gmra.mrb[0].mxu1 %vm464_vm1, %v1787_v23  ;;  %v1834_v30 = vcombine.low %v1111_v19, %v1112_v29  ;;  %vm2494_vm8 = vmpackc.low %vm350_vm6, %vm350_vm6  ;;  %v389_v7 = vsel %vm2490_vm0, %v2267_v14, 0  ;;  %v712_v45 = vsel %vm2385_vm2, %v2253_v9, 0 }
  0x2e   : > { %1961 = vmatpush3.bf16.msra.mxu1 %v2316_v57  ;;  %vm359_vm9 = vcmp.ne.s32.totalorder %v295_v31, 7  ;;  %vm360_vm13 = vcmp.ne.s32.totalorder %v302_v36, 7  ;;  %v390_v57 = vsel %vm2494_vm8, %v2272_v16, 0  ;;  %vm351_vm6 = vcmp.ne.s32.totalorder %v295_v31, 0 }
  0x2f   : > { %1970 = vmatprep.subr.bf16.mxu1 %v2475_v25  ;;  %v2502_v24 = vrot.slane %v1834_v30, 1  ;;  %vm667_vm11 = vmpackc.low %vm359_vm9, %vm359_vm9  ;;  %v1788_v38 = vcombine.low %v389_v7, %v390_v57  ;;  %vm352_vm12 = vcmp.ne.s32.totalorder %v302_v36, 0  ;;  %v1242_v57 = vsel %vm2392_vm4, %v2259_v11, 0 }
  0x30   : > { %vm668_vm10 = vmpackc.low %vm360_vm13, %vm360_vm13  ;;  %v675_v44 = vsel %vm667_vm11, 65537, %v2167_v13  ;;  %vm2796_vm13 = vcmp.ne.s16.totalorder %v2411_v40, 0  ;;  %vm2797_vm11 = vcmp.ne.s16.totalorder %v2418_v43, 0 }
  0x31   : > { %v1146_v42 = vsel %vm2767_vm3, %v1143_v61, %v2502_v24  ;;  %v676_v47 = vsel %vm668_vm10, 65537, %v2167_v13  ;;  %v697_v48 = vrot.slane %v675_v44, 7  ;;  %1956 = vmatprep.mubr.msk.bf16.mxu1 %vm464_vm1, %v1788_v38  ;;  %vm2521_vm9 = vmpackc.low %vm351_vm6, %vm351_vm6  ;;  %v713_v51 = vsel %vm2796_vm13, %v2256_v10, 0 }
  0x32   : > { %1993 = vmatmul.mubr.msk.bf16.vlgmr.msra.gmra.mrb[0].mxu0 %vm464_vm1, %v1146_v42  ;;  %v714_v9 = vsel %vm2797_vm11, %v2259_v11, 0  ;;  %v700_v53 = vrot.slane %v676_v47, 7  ;;  %vm2532_vm10 = vmpackc.low %vm352_vm12, %vm352_vm12  ;;  %v391_v55 = vsel %vm2521_vm9, %v2281_v20, 0  ;;  %vm2800_vm6 = vcmp.ne.s16.totalorder %v2424_v46, 0 }
  0x33   : > { %2001 = vmatpush3.bf16.msra.mxu0 %v2311_v56  ;;  %v715_v58 = vsel %vm2800_vm6, %v2262_v12, 0  ;;  %v1797_v59 = vcombine.low %v712_v45, %v713_v51  ;;  %v2544_v60 = vsel %vm2334_vm5, %v696_v27, %v697_v48  ;;  %v699_v0 = vrot.slane %v697_v48, 4 }
  0x34   : > { %v392_v56 = vsel %vm2532_vm10, %v2284_v21, 0  ;;  %2010 = vmatprep.subr.bf16.mxu0 %v2510_v41  ;;  %v1798_v6 = vcombine.low %v714_v9, %v715_v58  ;;  %vm709_vm12 = vcmp.ne.s16.totalorder %v2544_v60, 0  ;;  %v2554_v17 = vrot.slane %v700_v53, 4  ;;  %v239_v58 = vld [vmem:[%s2240_s30 + $0x28] sm:$0x1] }
  0x35   : > { %v1789_v8 = vcombine.low %v391_v55, %v392_v56  ;;  %v748_v61 = vrot.slane %v1797_v59, 1  ;;  %v2558_v19 = vsel %vm2334_vm5, %v699_v0, %v700_v53  ;;  %v1113_v23 = vsel %vm709_vm12, %v2284_v21, 0 }
  0x36   : > { %v749_v22 = vrot.slane %v1798_v6, 1  ;;  %vm2801_vm13 = vcmp.ne.s16.totalorder %v2452_v3, 0  ;;  %vm710_vm11 = vcmp.ne.s16.totalorder %v2558_v19, 0  ;;  %vm711_vm6 = vcmp.ne.s16.totalorder %v2554_v17, 0 }
  0x37   : > { %v716_v26 = vsel %vm2801_vm13, %v2267_v14, 0  ;;  %1957 = vmatmul.mubr.msk.bf16.gmra.mrb[4].mxu1 %vm464_vm1, %v1789_v8  ;;  %vm2802_vm3 = vcmp.ne.s16.totalorder %v2467_v18, 0  ;;  %v1114_v28 = vsel %vm710_vm11, %v2292_v35, 0  ;;  %v1115_v29 = vsel %vm711_vm6, %v2552_v15, 0 }
  0x38   : > { %v717_v1 = vsel %vm2802_vm3, %v2272_v16, 0  ;;  %vm2803_vm5 = vcmask 1046528   ;;  %v1835_v36 = vcombine.low %v1113_v23, %v1114_v28  ;;  %v1836_v7 = vcombine.low %v1115_v29, %v1115_v29 }
  0x39   : > { %v750_v30 = vsel %vm2803_vm5, %v748_v61, %v749_v22  ;;  %v1799_v31 = vcombine.low %v716_v26, %v717_v1  ;;  %v1243_v27 = vsel %vm2404_vm7, %v2262_v12, 0  ;;  %v718_v42 = vsel %vm709_vm12, %v2281_v20, 0  ;;  %vm2804_vm3 = vmmov %vm2803_vm5 }
  0x3a   : > { %1962 = vmatprep.mubr.msk.bf16.mxu1 %vm464_vm1, %v750_v30  ;;  %v1147_v44 = vrot.slane %v1835_v36, 1  ;;  %v1149_v45 = vrot.slane %v1836_v7, 1  ;;  %v1244_v47 = vsel %vm2438_vm14, %v2267_v14, 0  ;;  %v719_v48 = vsel %vm710_vm11, %v2284_v21, 0  ;;  %vm2805_vm13 = vmmov %vm2804_vm3 }
  0x3b   : > { %v751_v38 = vrot.slane %v1799_v31, 1  ;;  %v1844_v51 = vcombine.low %v1242_v57, %v1243_v27  ;;  %v1800_v53 = vcombine.low %v718_v42, %v719_v48  ;;  %v720_v55 = vsel %vm711_vm6, %v2292_v35, 0  ;;  %vm2806_vm5 = vmmov %vm2804_vm3 }
  0x3c   : > { %v1148_v59 = vsel %vm2805_vm13, %v2502_v24, %v1147_v44  ;;  %v1150_v0 = vsel %vm2806_vm5, %v1147_v44, %v1149_v45  ;;  %v1245_v56 = vsel %vm2454_vm15, %v2272_v16, 0  ;;  %v1801_v6 = vcombine.low %v720_v55, %v720_v55  ;;  %vm2808_vm5 = vmmov %vm2804_vm3 }
  0x3d   : > { %v752_v9 = vsel %vm2804_vm3, %v749_v22, %v751_v38  ;;  %1996 = vmatprep.mubr.msk.bf16.mxu0 %vm464_vm1, %v1148_v59  ;;  %v1246_v8 = vsel %vm2490_vm0, %v2281_v20, 0  ;;  %v1247_v61 = vsel %vm2494_vm8, %v2284_v21, 0  ;;  %v753_v23 = vrot.slane %v1800_v53, 1 }
  0x3e   : > { %1997 = vmatmul.mubr.msk.bf16.gmra.mrb[4].mxu0 %vm464_vm1, %v1150_v0  ;;  %v755_v24 = vrot.slane %v1801_v6, 1  ;;  %v1855_v22 = vcombine.low %v2292_v35, %v2552_v15  ;;  %v1856_v26 = vcombine.low %v239_v58, %v239_v58  ;;  %v1845_v1 = vcombine.low %v1244_v47, %v1245_v56 }
  0x3f   : > { %1963 = vmatmul.mubr.msk.bf16.vlgmr.msra.gmra.mrb[0].mxu1 %vm464_vm1, %v752_v9  ;;  %2002 = vmatprep.mubr.msk.bf16.mxu0 %vm464_vm1, %v1844_v51  ;;  %v754_v28 = vsel %vm2804_vm3, %v751_v38, %v753_v23  ;;  %v1846_v29 = vcombine.low %v1246_v8, %v1247_v61  ;;  %v848_v7 = vsel %vm2392_vm4, %v2256_v10, 0  ;;  %v849_v57 = vsel %vm2404_vm7, %v2259_v11, 0 }
  0x40   : > { %1971 = vmatpush3.bf16.msra.mxu1 %v2475_v25  ;;  %1966 = vmatprep.mubr.msk.bf16.mxu1 %vm464_vm1, %v754_v28  ;;  %v1372_v30 = vshll.u32 %v1855_v22, 16  ;;  %v1376_v31 = vshrl.u32 %v1855_v22, 16  ;;  %v1380_v36 = vshll.u32 %v1856_v26, 16  ;;  %v1469_v25 = vsel %vm2385_vm2, %v2259_v11, 0 }
  0x41   : > { %2030 = vmatprep.subr.bf16.mxu1 %v2217_v2  ;;  %vm2807_vm13 = vcmp.ne.s16.totalorder %v2411_v40, 0  ;;  %v756_v38 = vsel %vm2808_vm5, %v753_v23, %v755_v24  ;;  %vm2809_vm3 = vcmp.ne.s16.totalorder %v2418_v43, 0  ;;  %vm2810_vm4 = vcmp.ne.s16.totalorder %v2424_v46, 0  ;;  %v2138_v40 = vld [vmem:[%s2757_s1 + $0x40] sm:$0xff]  }
  0x42   : > { %v1470_v27 = vsel %vm2807_vm13, %v2262_v12, 0  ;;  %v1374_v42 = vrot.slane %v1372_v30, 1  ;;  %v1382_v44 = vrot.slane %v1380_v36, 1  ;;  %v1471_v10 = vsel %vm2809_vm3, %v2267_v14, 0 }
  0x43   : > { %v1472_v33 = vsel %vm2810_vm4, %v2272_v16, 0  ;;  %v1864_v39 = vcombine.low %v1469_v25, %v1470_v27  ;;  %vm2811_vm2 = vcmp.ne.s16.totalorder %v2452_v3, 0  ;;  %vm2812_vm7 = vcmp.ne.s16.totalorder %v2467_v18, 0  ;;  %v1874_v25 = vld [vmem:[%s2758_s2] ss:$0 sm:$0xff] }
  0x44   : > { %v1473_v11 = vsel %vm2811_vm2, %v2281_v20, 0  ;;  %v1474_v32 = vsel %vm2812_vm7, %v2284_v21, 0  ;;  %v1809_v45 = vcombine.low %v848_v7, %v849_v57  ;;  %v1378_v43 = vor.u32 %v1376_v31, %v1374_v42 }
  0x45   : > { %v1865_v47 = vcombine.low %v1471_v10, %v1472_v33  ;;  %v1866_v48 = vcombine.low %v1473_v11, %v1474_v32  ;;  %v1248_v46 = vsel %vm2521_vm9, %v2292_v35, 0  ;;  %v1504_v51 = vrot.slane %v1864_v39, 1 }
  0x46   : > { %v1475_v3 = vsel %vm709_vm12, %v2292_v35, 0  ;;  %2003 = vmatmul.mubr.msk.bf16.vlgmr.msra.gmra.mrb[0].mxu0 %vm464_vm1, %v1845_v1  ;;  %vm2813_vm13 = vsmask.f32 7424  ;;  %v1476_v55 = vsel %vm710_vm11, %v2552_v15, 0  ;;  %v1249_v60 = vsel %vm2532_vm10, %v2552_v15, 0  ;;  %vm2814_vm12 = vmmov %vm2808_vm5 }
  0x47   : > { %1967 = vmatmul.mubr.msk.bf16.gmra.mrb[4].mxu1 %vm464_vm1, %v756_v38  ;;  %v1383_v18 = vsel %vm2813_vm13, %v1378_v43, %v1382_v44  ;;  %v1505_v9 = vrot.slane %v1865_v47, 1  ;;  %v1507_v53 = vrot.slane %v1866_v48, 1  ;;  %2011 = vmatpush3.bf16.msra.mxu0 %v2510_v41  ;;  %v850_v59 = vsel %vm2438_vm14, %v2262_v12, 0  ;;  %vm2815_vm11 = vmmov %vm2808_vm5 }
  0x48   : > { %2006 = vmatprep.mubr.msk.bf16.mxu0 %vm464_vm1, %v1846_v29  ;;  %v851_v0 = vsel %vm2454_vm15, %v2267_v14, 0  ;;  %v1867_v56 = vcombine.low %v1475_v3, %v1476_v55  ;;  %2020 = vmatprep.subr.bf16.mxu0 %v2138_v40  ;;  %v852_v41 = vsel %vm2490_vm0, %v2272_v16, 0  ;;  %v1477_v54 = vsel %vm711_vm6, %v239_v58, 0  ;;  %vm2816_vm14 = vmmov %vm2808_vm5 }
  0x49   : > { %1972 = vmatprep.mubr.msk.bf16.mxu1 %vm464_vm1, %v1809_v45  ;;  %v1506_v19 = vsel %vm2814_vm12, %v1504_v51, %v1505_v9  ;;  %v1508_v6 = vsel %vm2815_vm11, %v1505_v9, %v1507_v53  ;;  %v853_v12 = vsel %vm2494_vm8, %v2281_v20, 0  ;;  %v1823_v14 = vcombine.low %v2284_v21, %v2292_v35  ;;  %vm2817_vm0 = vmmov %vm2808_vm5 }
  0x4a   : > { %v1509_v4 = vrot.slane %v1867_v56, 1  ;;  %v1868_v8 = vcombine.low %v1477_v54, %v1477_v54  ;;  %v1847_v61 = vcombine.low %v1248_v46, %v1249_v60  ;;  %v1810_v23 = vcombine.low %v850_v59, %v851_v0  ;;  %vm2818_vm15 = vmmov %vm2813_vm13 }
  0x4b   : > { %v1811_v24 = vcombine.low %v852_v41, %v853_v12  ;;  %v1000_v22 = vshrl.u32 %v2289_v34, 16  ;;  %v1004_v26 = vshll.u32 %v1823_v14, 16  ;;  %v854_v20 = vsel %vm2521_vm9, %v2284_v21, 0  ;;  %vm2819_vm8 = vmmov %vm2813_vm13 }
  0x4c   : > { %v1510_v16 = vsel %vm2816_vm14, %v1507_v53, %v1509_v4  ;;  %v1511_v5 = vrot.slane %v1868_v8, 1  ;;  %v855_v34 = vsel %vm2532_vm10, %v2292_v35, 0  ;;  %v1824_v28 = vcombine.low %v2552_v15, %v2552_v15  ;;  %vm2820_vm9 = vmmov %vm2819_vm8 }
  0x4d   : > { %v1002_v37 = vor.u32 %v1000_v22, %v2301_v50  ;;  %v1006_v58 = vrot.slane %v1004_v26, 1  ;;  %v1812_v1 = vcombine.low %v854_v20, %v855_v34  ;;  %v1008_v21 = vshrl.u32 %v1823_v14, 16 }
  0x4e   : > { %v1512_v17 = vsel %vm2817_vm0, %v1509_v4, %v1511_v5  ;;  %2007 = vmatmul.mubr.msk.bf16.gmra.mrb[4].mxu0 %vm464_vm1, %v1847_v61  ;;  %v1012_v35 = vshll.u32 %v1824_v28, 16 }
  0x4f   : > { %1973 = vmatmul.mubr.msk.bf16.vlgmr.msra.gmra.mrb[0].mxu1 %vm464_vm1, %v1810_v23  ;;  %2012 = vmatprep.mubr.msk.bf16.mxu0 %vm464_vm1, %v2306_v52  ;;  %v1007_v52 = vsel %vm2819_vm8, %v1002_v37, %v1006_v58  ;;  %v1010_v50 = vor.u32 %v1008_v21, %v1006_v58 }
  0x50   : > { %2031 = vmatpush3.bf16.msra.mxu1 %v2217_v2  ;;  %1976 = vmatprep.mubr.msk.bf16.mxu1 %vm464_vm1, %v1811_v24  ;;  %v1375_v2 = vsel %vm2818_vm15, %v2330_v63, %v1374_v42  ;;  %v1014_v49 = vrot.slane %v1012_v35, 1  ;;  %v1875_v42 = vld [vmem:[%s2759_s3] ss:$0 sm:$0xff] }
  0x52   : > { %v1015_v63 = vsel %vm2820_vm9, %v1010_v50, %v1014_v49 }
  0x56   : > { %2013 = vmatmul.mubr.msk.bf16.vlgmr.msra.gmra.mrb[0].mxu0 %vm464_vm1, %v2328_v62 }
  0x57   : > { %1977 = vmatmul.mubr.msk.bf16.gmra.mrb[4].mxu1 %vm464_vm1, %v1812_v1  ;;  %2021 = vmatpush3.bf16.msra.mxu0 %v2138_v40 }
  0x58   : > { %2016 = vmatprep.mubr.msk.bf16.mxu0 %vm464_vm1, %v1375_v2  ;;  %1986 = vmatprep.mubr.msk.bf16.mxu1 %vm464_vm1, %v1007_v52 }
  0x5e   : > { %2017 = vmatmul.mubr.msk.bf16.gmra.mrb[4].mxu0 %vm464_vm1, %v1383_v18 }
  0x5f   : > { %2022 = vmatprep.mubr.msk.bf16.mxu0 %vm464_vm1, %v1506_v19 }
  0x63   : > { %1987 = vmatmul.mubr.msk.bf16.vlgmr.msra.gmra.mrb[4].mxu1 %vm464_vm1, %v1015_v63 }
  0x66   : > { %2023 = vmatmul.mubr.msk.bf16.vlgmr.msra.gmra.mrb[0].mxu0 %vm464_vm1, %v1508_v6 }
  0x67   : > { %2026 = vmatprep.mubr.msk.bf16.mxu0 %vm464_vm1, %v1510_v16 }
  0x6e   : > { %2027 = vmatmul.mubr.msk.bf16.gmra.mrb[4].mxu0 %vm464_vm1, %v1512_v17  ;;  %vm1674_vm1 = vcmask 60416  }
 0x122   : > { %v1974_v62 = vpop.f32.mrb[0].mxu1 }
 0x123   : > { %v931_v13 = vpop.f32.mrb[1].mxu1 }
 0x124   : > { %v1975_v15 = vpop.f32.mrb[2].mxu1 }
 0x125   : > { %v934_v29 = vpop.f32.mrb[3].mxu1 }
 0x136   : > { %v1988_v30 = vpop.f32.mrb[4].mxu1 }
 0x137   : > { %v1084_v31 = vpop.f32.mrb[5].mxu1 }
 0x138   : > { %v1989_v36 = vpop.f32.mrb[6].mxu1 }
 0x139   : > { %v1087_v7 = vpop.f32.mrb[7].mxu1  ;;  %v2024_v57 = vpop.f32.mrb[0].mxu0 }
 0x13a   : > { %v2032_v27 = vadd.f32 %v2024_v57, %v1974_v62  ;;  %v1565_v38 = vpop.f32.mrb[1].mxu0 }
 0x13b   : > { %v2033_v44 = vadd.f32 %v1565_v38, %v931_v13  ;;  %v2025_v10 = vpop.f32.mrb[2].mxu0 }
 0x13c   : > { %v1613_v33 = vmul.f32 %v2032_v27, %v1874_v25  ;;  %v2034_v39 = vadd.f32 %v2025_v10, %v1975_v15  ;;  %v1568_v11 = vpop.f32.mrb[3].mxu0 }
 0x13d   : > { %v1611_v32 = vmul.f32 %v2033_v44, %v1874_v25  ;;  %v2035_v40 = vadd.f32 %v1568_v11, %v934_v29 }
 0x13e   : > { %v1628_v45 = vadd.f32 %v1875_v42, %v1613_v33  ;;  %v1614_v43 = vmul.f32 %v2034_v39, %v1874_v25 }
 0x13f   : > { %v1626_v47 = vadd.f32 %v1875_v42, %v1611_v32  ;;  %v1612_v48 = vmul.f32 %v2035_v40, %v1874_v25 }
 0x140   : > { %v1636_v46 = vmax.f32 %v1628_v45, 0.0  ;;  %v1629_v51 = vadd.f32 %v1875_v42, %v1614_v43 }
 0x141   : > { %v1634_v3 = vmax.f32 %v1626_v47, 0.0  ;;  %v1627_v18 = vadd.f32 %v1875_v42, %v1612_v48  ;;  %v2028_v9 = vpop.f32.mrb[4].mxu0 }
 0x142   : > { %v1889_v53 = vpack.c.bf16 %v1636_v46, %v1636_v46  ;;  %v1637_v55 = vmax.f32 %v1629_v51, 0.0  ;;  %v2036_v60 = vadd.f32 %v2028_v9, %v1988_v30  ;;  %v1581_v59 = vpop.f32.mrb[5].mxu0 }
 0x143   : > { %v1887_v0 = vpack.c.bf16 %v1634_v3, %v1634_v3  ;;  %v1635_v56 = vmax.f32 %v1627_v18, 0.0  ;;  %v2037_v41 = vadd.f32 %v1581_v59, %v1084_v31  ;;  %v2029_v19 = vpop.f32.mrb[6].mxu0 }
 0x144   : > { %1677 = vst.msk [vmem:[%s2729_s26 + $0x8] sm:$0xf] %vm1674_vm1, %v1889_v53  ;;  %v1890_v6 = vpack.c.bf16 %v1637_v55, %v1637_v55  ;;  %v1617_v54 = vmul.f32 %v2036_v60, %v1874_v25  ;;  %v2038_v12 = vadd.f32 %v2029_v19, %v1989_v36  ;;  %v1584_v14 = vpop.f32.mrb[7].mxu0 }
 0x145   : > { %1675 = vst.msk [vmem:[%s2729_s26] sm:$0xf] %vm1674_vm1, %v1887_v0  ;;  %v1888_v4 = vpack.c.bf16 %v1635_v56, %v1635_v56  ;;  %v1615_v8 = vmul.f32 %v2037_v41, %v1874_v25  ;;  %v2039_v61 = vadd.f32 %v1584_v14, %v1087_v7 }
 0x146   : > { %1678 = vst.msk [vmem:[%s2729_s26 + $0xc] sm:$0xf] %vm1674_vm1, %v1890_v6  ;;  %v1632_v23 = vadd.f32 %v1875_v42, %v1617_v54  ;;  %v1618_v16 = vmul.f32 %v2038_v12, %v1874_v25 }
 0x147   : > { %1676 = vst.msk [vmem:[%s2729_s26 + $0x4] sm:$0xf] %vm1674_vm1, %v1888_v4  ;;  %v1630_v5 = vadd.f32 %v1875_v42, %v1615_v8  ;;  %v1616_v24 = vmul.f32 %v2039_v61, %v1874_v25 }
 0x148   : > { %v1640_v22 = vmax.f32 %v1632_v23, 0.0  ;;  %v1633_v26 = vadd.f32 %v1875_v42, %v1618_v16 }
 0x149   : > { %v1638_v17 = vmax.f32 %v1630_v5, 0.0  ;;  %v1631_v20 = vadd.f32 %v1875_v42, %v1616_v24 }
 0x14a   : > { %v1893_v34 = vpack.c.bf16 %v1640_v22, %v1640_v22  ;;  %v1641_v37 = vmax.f32 %v1633_v26, 0.0 }
 0x14b   : > { %v1891_v58 = vpack.c.bf16 %v1638_v17, %v1638_v17  ;;  %v1639_v1 = vmax.f32 %v1631_v20, 0.0 }
 0x14c   : > { %1681 = vst.msk [vmem:[%s2729_s26 + $0x18] sm:$0xf] %vm1674_vm1, %v1893_v34  ;;  %v1894_v28 = vpack.c.bf16 %v1641_v37, %v1641_v37 }
 0x14d   : > { %1679 = vst.msk [vmem:[%s2729_s26 + $0x10] sm:$0xf] %vm1674_vm1, %v1891_v58  ;;  %v1892_v2 = vpack.c.bf16 %v1639_v1, %v1639_v1 }
 0x14e   : > { %1682 = vst.msk [vmem:[%s2729_s26 + $0x1c] sm:$0xf] %vm1674_vm1, %v1894_v28 }
 0x14f   : > { %1680 = vst.msk [vmem:[%s2729_s26 + $0x14] sm:$0xf] %vm1674_vm1, %v1892_v2 }
 0x150 PF: > { %s14_s17 = sadd.s32 1, %s2165_s17   ;;  %s2821_s15 = smov %s2161_s16 }
 0x151   : > { %p11_p5 = scmp.ge.s32.totalorder %s14_s17, 4   ;;  %s2822_s16 = smov %s2824_s18 }
 0x153   :  { %13 = sbr.rel (!%p11_p5) target bundleno = 2 (0x2), region = 75 }

</bundles_post_ra>
